<compile_context>
chip_gen: v6e
topology: v6e:2x2x1
jax: 0.10.0
libtpu: 0.0.40
codegen_flags: <defaults>
</compile_context>

<pallas_src>
import jax
import jax.numpy as jnp
from jax.experimental import pallas as pl
from jax.experimental.pallas import tpu as pltpu


# ----------------------------- Pallas kernel ------------------------------ #
def widedeep_kernel(
    x_ref,            # (86, TB) bf16 transposed slab (row 85 = precomputed wide gather)
    w1_ref, b1_ref,   # (64, 86) bf16 (col 85 zero), (64, 1) f32
    w2_ref, b2_ref,   # (32, 64) bf16, (32, 1) f32
    w3_ref, b3_ref,   # (16, 32) bf16, (16, 1) f32
    w4_ref,           # (1, 16)  bf16
    ww_ref,           # (1, 86)  bf16 = [0(64) | w_wide_dense(21) | 1]
    bt_ref,           # (1, 1)   f32  = b4 + b_wide
    out_ref,          # (1, TB)  f32  lane-dense probabilities
):
    f32 = jnp.float32
    bf16 = jnp.bfloat16
    x = x_ref[...]                                                     # (86, TB) bf16

    # wide branch: reuses the x vregs already loaded for layer 1
    wide = jnp.dot(ww_ref[...], x, preferred_element_type=f32)        # (1, TB)

    # deep MLP 85 -> 64 -> 32 -> 16, weights stationary, batch on lanes.
    # bf16 MXU operands, f32 accumulation / biases / ReLU.
    h = jnp.dot(w1_ref[...], x, preferred_element_type=f32) + b1_ref[...]
    h = jnp.maximum(h, 0.0)                                            # (64, TB)
    h = jnp.dot(w2_ref[...], h.astype(bf16), preferred_element_type=f32) + b2_ref[...]
    h = jnp.maximum(h, 0.0)                                            # (32, TB)
    h = jnp.dot(w3_ref[...], h.astype(bf16), preferred_element_type=f32) + b3_ref[...]
    h = jnp.maximum(h, 0.0)                                            # (16, TB)
    deep = jnp.dot(w4_ref[...], h.astype(bf16), preferred_element_type=f32)  # (1, TB)

    logits = wide + deep + bt_ref[...]                                 # (1, TB)
    # exact sigmoid: exp + reciprocal both ride the (idle) EUP slot
    out_ref[...] = pl.reciprocal(1.0 + jnp.exp(-logits), approx=False)


# ------------------------------- parameters ------------------------------- #
def init_params(key, num_users, num_movies, embedding_dim, num_genres, hidden_units):
    """Deterministic parameter init (uniform +-1/sqrt(fan_in), like PyTorch)."""
    wide_input_dim = num_users + num_movies + 3 + num_genres
    deep_input_dim = embedding_dim * 2 + 3 + num_genres

    keys = jax.random.split(key, 16)
    ki = iter(keys)

    def lin(kw, kb, fan_in, fan_out):
        bound = 1.0 / jnp.sqrt(fan_in)
        w = jax.random.uniform(kw, (fan_in, fan_out), jnp.float32, -bound, bound)
        b = jax.random.uniform(kb, (1, fan_out), jnp.float32, -bound, bound)
        return w, b

    params = {}
    params["w_wide"], params["b_wide"] = lin(next(ki), next(ki), wide_input_dim, 1)
    params["user_emb"] = jax.random.normal(next(ki), (num_users, embedding_dim), jnp.float32)
    params["movie_emb"] = jax.random.normal(next(ki), (num_movies, embedding_dim), jnp.float32)
    dims = [deep_input_dim] + list(hidden_units) + [1]
    for li in range(len(dims) - 1):
        w, b = lin(next(ki), next(ki), dims[li], dims[li + 1])
        params[f"w{li + 1}"] = w
        params[f"b{li + 1}"] = b
    return params


# -------------------------------- wrapper ---------------------------------- #
def _round_up(x, m):
    return ((x + m - 1) // m) * m


def wide_deep_forward(params, user_ids, movie_ids, gender, age, occupation, genres,
                      num_users, num_movies, tile_b=8192):
    f32 = jnp.float32
    bf16 = jnp.bfloat16
    B = user_ids.shape[0]

    # -------- data-dependent row gathers stay in XLA glue --------
    # TODO(synk): move the embedding / wide-weight row gathers in-kernel
    # (scalar-prefetch ids + VMEM-resident tables, ~0.7 MB bf16) to eliminate the
    # (86, B) slab HBM round trip entirely.
    user_e = params["user_emb"][user_ids]                              # (B, 32)
    movie_e = params["movie_emb"][movie_ids]                           # (B, 32)
    w_wide = params["w_wide"]                                          # (wide_dim, 1)
    wide_gather = w_wide[user_ids, 0] + w_wide[num_users + movie_ids, 0]   # (B,)

    # transposed, lane-dense bf16 slab: features on sublanes, batch on lanes
    slab_t = jnp.concatenate(
        [user_e.T, movie_e.T,
         gender.reshape(1, B).astype(f32),
         age.reshape(1, B).astype(f32),
         occupation.reshape(1, B).astype(f32),
         genres.astype(f32).T,
         wide_gather.reshape(1, B)],
        axis=0).astype(bf16)                                           # (86, B)
    Fdim = slab_t.shape[0]

    # -------- fused / transposed weights (bf16 MXU operands, f32 biases) --------
    nz = num_users + num_movies
    w1t = jnp.concatenate(
        [params["w1"].T, jnp.zeros((params["w1"].shape[1], 1), f32)], axis=1
    ).astype(bf16)                                                     # (64, 86); zero col masks gather row
    b1 = params["b1"].reshape(-1, 1)                                   # (64, 1) f32
    w2t = params["w2"].T.astype(bf16)                                  # (32, 64)
    b2 = params["b2"].reshape(-1, 1)
    w3t = params["w3"].T.astype(bf16)                                  # (16, 32)
    b3 = params["b3"].reshape(-1, 1)
    w4t = params["w4"].T.astype(bf16)                                  # (1, 16)
    ww_row = jnp.concatenate(
        [jnp.zeros((1, 64), f32), w_wide[nz:, :].T, jnp.ones((1, 1), f32)], axis=1
    ).astype(bf16)                                                     # (1, 86)
    b_tail = (params["b4"] + params["b_wide"]).reshape(1, 1)           # (1, 1) f32

    # -------- batch tiling: 512-lane granularity, >=2 tiles for v7x dual-TC --------
    LANE = 512
    B_min = _round_up(B, LANE)
    TB = min(_round_up(max(tile_b, 1), LANE), B_min)
    if B_min >= 2 * LANE:                     # keep both TensorCores busy on v7x
        TB = min(TB, _round_up(B_min // 2, LANE))
    TB = max(TB, LANE)
    B_pad = _round_up(B, TB)
    if B_pad != B:
        slab_t = jnp.pad(slab_t, ((0, 0), (0, B_pad - B)))
    G = B_pad // TB

    def resident(arr):  # weights: constant index_map -> fetched once, VMEM-resident
        return pl.BlockSpec(arr.shape, lambda i: (0, 0))

    probs = pl.pallas_call(
        widedeep_kernel,
        out_shape=jax.ShapeDtypeStruct((1, B_pad), f32),
        grid_spec=pltpu.PrefetchScalarGridSpec(
            num_scalar_prefetch=0,
            grid=(G,),
            in_specs=[
                pl.BlockSpec((Fdim, TB), lambda i: (0, i)),
                resident(w1t), resident(b1),
                resident(w2t), resident(b2),
                resident(w3t), resident(b3),
                resident(w4t), resident(ww_row), resident(b_tail),
            ],
            out_specs=pl.BlockSpec((1, TB), lambda i: (0, i)),
        ),
        compiler_params=pltpu.CompilerParams(
            dimension_semantics=("parallel",),
        ),
    )(slab_t, w1t, b1, w2t, b2, w3t, b3, w4t, ww_row, b_tail)
    return probs[0, :B]  # squeeze(1)


# ------------------------- pure-JAX f32 reference -------------------------- #
def reference_forward(params, user_ids, movie_ids, gender, age, occupation, genres,
                      num_users, num_movies):
    f32 = jnp.float32
    B = user_ids.shape[0]
    g = gender.reshape(B, 1).astype(f32)
    a = age.reshape(B, 1).astype(f32)
    o = occupation.reshape(B, 1).astype(f32)
    gen = genres.astype(f32)

    w_wide = params["w_wide"]
    wide_dense = jnp.concatenate([g, a, o, gen], axis=1)              # (B, 21)
    wide = (w_wide[user_ids, :] + w_wide[num_users + movie_ids, :]
            + wide_dense @ w_wide[num_users + num_movies:, :]
            + params["b_wide"])                                       # (B, 1)

    deep_in = jnp.concatenate(
        [params["user_emb"][user_ids], params["movie_emb"][movie_ids], g, a, o, gen], axis=1)
    h = deep_in
    for li in (1, 2, 3):
        h = jnp.maximum(h @ params[f"w{li}"] + params[f"b{li}"], 0.0)
    deep = h @ params["w4"] + params["b4"]
    return jax.nn.sigmoid(wide + deep)[:, 0]


# ---------------------------------- main ----------------------------------- #
if __name__ == "__main__":
    NUM_USERS = 6041
    NUM_MOVIES = 3953
    EMB_DIM = 32
    NUM_GENRES = 18
    HIDDEN = [64, 32, 16]
    B = 4

    key = jax.random.PRNGKey(0)
    kp, ku, km, kg, ka, ko, kgen = jax.random.split(key, 7)

    params = init_params(kp, NUM_USERS, NUM_MOVIES, EMB_DIM, NUM_GENRES, HIDDEN)

    user_ids = jax.random.randint(ku, (B,), 0, NUM_USERS, dtype=jnp.int32)
    movie_ids = jax.random.randint(km, (B,), 0, NUM_MOVIES, dtype=jnp.int32)
    gender = jax.random.randint(kg, (B,), 0, 2).astype(jnp.float32)
    age = jax.random.uniform(ka, (B,), jnp.float32, 18.0, 60.0)
    occupation = jax.random.randint(ko, (B,), 0, 21).astype(jnp.float32)
    genres = (jax.random.uniform(kgen, (B, NUM_GENRES)) < 0.2).astype(jnp.float32)

    probs = wide_deep_forward(params, user_ids, movie_ids, gender, age, occupation,
                              genres, NUM_USERS, NUM_MOVIES)
    probs = jax.block_until_ready(probs)
    assert probs.shape == (B,)

    ref = jax.block_until_ready(
        reference_forward(params, user_ids, movie_ids, gender, age, occupation,
                          genres, NUM_USERS, NUM_MOVIES))
    # bf16 slab + bf16 MXU operands (f32 accumulation) -> loose-but-meaningful tolerance
    assert jnp.allclose(probs, ref, atol=3e-2), (probs, ref)

    print("KERNEL_OK")
</pallas_src>

<mosaic_0001>
module attributes {stable_mosaic.version = 11 : i64} {
  func.func @widedeep_kernel(%arg0: i32, %arg1: memref<86x512xbf16, #tpu.memory_space<vmem>>, %arg2: memref<64x86xbf16, #tpu.memory_space<vmem>>, %arg3: memref<64x1xf32, #tpu.memory_space<vmem>>, %arg4: memref<32x64xbf16, #tpu.memory_space<vmem>>, %arg5: memref<32x1xf32, #tpu.memory_space<vmem>>, %arg6: memref<16x32xbf16, #tpu.memory_space<vmem>>, %arg7: memref<16x1xf32, #tpu.memory_space<vmem>>, %arg8: memref<1x16xbf16, #tpu.memory_space<vmem>>, %arg9: memref<1x86xbf16, #tpu.memory_space<vmem>>, %arg10: memref<1x1xf32, #tpu.memory_space<vmem>>, %arg11: memref<1x512xf32, #tpu.memory_space<vmem>>) attributes {dimension_semantics = [#tpu.dimension_semantics<parallel>], iteration_bounds = array<i64: 1>, scalar_prefetch = 0 : i64, scratch_operands = 0 : i64, tpu.core_type = #tpu.core_type<tc>, window_params = [{transform_indices = @transform_0, window_bounds = array<i64: 86, 512>}, {pipeline_mode = #tpu.pipeline_mode<synchronous>, transform_indices = @transform_1, window_bounds = array<i64: 64, 86>}, {pipeline_mode = #tpu.pipeline_mode<synchronous>, transform_indices = @transform_2, window_bounds = array<i64: 64, 1>}, {pipeline_mode = #tpu.pipeline_mode<synchronous>, transform_indices = @transform_3, window_bounds = array<i64: 32, 64>}, {pipeline_mode = #tpu.pipeline_mode<synchronous>, transform_indices = @transform_4, window_bounds = array<i64: 32, 1>}, {pipeline_mode = #tpu.pipeline_mode<synchronous>, transform_indices = @transform_5, window_bounds = array<i64: 16, 32>}, {pipeline_mode = #tpu.pipeline_mode<synchronous>, transform_indices = @transform_6, window_bounds = array<i64: 16, 1>}, {pipeline_mode = #tpu.pipeline_mode<synchronous>, transform_indices = @transform_7, window_bounds = array<i64: 1, 16>}, {pipeline_mode = #tpu.pipeline_mode<synchronous>, transform_indices = @transform_8, window_bounds = array<i64: 1, 86>}, {pipeline_mode = #tpu.pipeline_mode<synchronous>, transform_indices = @transform_9, window_bounds = array<i64: 1, 1>}, {transform_indices = @transform_10, window_bounds = array<i64: 1, 512>}]} {
    %c0 = arith.constant 0 : index
    %c0_0 = arith.constant 0 : index
    %0 = vector.load %arg1[%c0, %c0_0] : memref<86x512xbf16, #tpu.memory_space<vmem>>, vector<86x512xbf16>
    %c0_1 = arith.constant 0 : index
    %c0_2 = arith.constant 0 : index
    %1 = vector.load %arg9[%c0_1, %c0_2] : memref<1x86xbf16, #tpu.memory_space<vmem>>, vector<1x86xbf16>
    %cst = arith.constant dense<0.000000e+00> : vector<1x512xf32>
    %2 = tpu.matmul %1, %0, %cst {dimension_numbers = #tpu.dot_dimension_numbers<[1], [0], [0], [1], [0, 0, 1, 1], [], []>} : vector<1x86xbf16>, vector<86x512xbf16>, vector<1x512xf32> -> vector<1x512xf32>
    %c0_3 = arith.constant 0 : index
    %c0_4 = arith.constant 0 : index
    %3 = vector.load %arg2[%c0_3, %c0_4] : memref<64x86xbf16, #tpu.memory_space<vmem>>, vector<64x86xbf16>
    %cst_5 = arith.constant dense<0.000000e+00> : vector<64x512xf32>
    %4 = tpu.matmul %3, %0, %cst_5 {dimension_numbers = #tpu.dot_dimension_numbers<[1], [0], [0], [1], [0, 0, 1, 1], [], []>} : vector<64x86xbf16>, vector<86x512xbf16>, vector<64x512xf32> -> vector<64x512xf32>
    %c0_6 = arith.constant 0 : index
    %c0_7 = arith.constant 0 : index
    %5 = vector.load %arg3[%c0_6, %c0_7] : memref<64x1xf32, #tpu.memory_space<vmem>>, vector<64x1xf32>
    %6 = vector.broadcast %5 : vector<64x1xf32> to vector<64x512xf32>
    %7 = arith.addf %4, %6 : vector<64x512xf32>
    %cst_8 = arith.constant 0.000000e+00 : f32
    %8 = vector.broadcast %cst_8 : f32 to vector<64x512xf32>
    %9 = arith.maximumf %7, %8 : vector<64x512xf32>
    %c0_9 = arith.constant 0 : index
    %c0_10 = arith.constant 0 : index
    %10 = vector.load %arg4[%c0_9, %c0_10] : memref<32x64xbf16, #tpu.memory_space<vmem>>, vector<32x64xbf16>
    %11 = arith.truncf %9 : vector<64x512xf32> to vector<64x512xbf16>
    %cst_11 = arith.constant dense<0.000000e+00> : vector<32x512xf32>
    %12 = tpu.matmul %10, %11, %cst_11 {dimension_numbers = #tpu.dot_dimension_numbers<[1], [0], [0], [1], [0, 0, 1, 1], [], []>} : vector<32x64xbf16>, vector<64x512xbf16>, vector<32x512xf32> -> vector<32x512xf32>
    %c0_12 = arith.constant 0 : index
    %c0_13 = arith.constant 0 : index
    %13 = vector.load %arg5[%c0_12, %c0_13] : memref<32x1xf32, #tpu.memory_space<vmem>>, vector<32x1xf32>
    %14 = vector.broadcast %13 : vector<32x1xf32> to vector<32x512xf32>
    %15 = arith.addf %12, %14 : vector<32x512xf32>
    %cst_14 = arith.constant 0.000000e+00 : f32
    %16 = vector.broadcast %cst_14 : f32 to vector<32x512xf32>
    %17 = arith.maximumf %15, %16 : vector<32x512xf32>
    %c0_15 = arith.constant 0 : index
    %c0_16 = arith.constant 0 : index
    %18 = vector.load %arg6[%c0_15, %c0_16] : memref<16x32xbf16, #tpu.memory_space<vmem>>, vector<16x32xbf16>
    %19 = arith.truncf %17 : vector<32x512xf32> to vector<32x512xbf16>
    %cst_17 = arith.constant dense<0.000000e+00> : vector<16x512xf32>
    %20 = tpu.matmul %18, %19, %cst_17 {dimension_numbers = #tpu.dot_dimension_numbers<[1], [0], [0], [1], [0, 0, 1, 1], [], []>} : vector<16x32xbf16>, vector<32x512xbf16>, vector<16x512xf32> -> vector<16x512xf32>
    %c0_18 = arith.constant 0 : index
    %c0_19 = arith.constant 0 : index
    %21 = vector.load %arg7[%c0_18, %c0_19] : memref<16x1xf32, #tpu.memory_space<vmem>>, vector<16x1xf32>
    %22 = vector.broadcast %21 : vector<16x1xf32> to vector<16x512xf32>
    %23 = arith.addf %20, %22 : vector<16x512xf32>
    %cst_20 = arith.constant 0.000000e+00 : f32
    %24 = vector.broadcast %cst_20 : f32 to vector<16x512xf32>
    %25 = arith.maximumf %23, %24 : vector<16x512xf32>
    %c0_21 = arith.constant 0 : index
    %c0_22 = arith.constant 0 : index
    %26 = vector.load %arg8[%c0_21, %c0_22] : memref<1x16xbf16, #tpu.memory_space<vmem>>, vector<1x16xbf16>
    %27 = arith.truncf %25 : vector<16x512xf32> to vector<16x512xbf16>
    %cst_23 = arith.constant dense<0.000000e+00> : vector<1x512xf32>
    %28 = tpu.matmul %26, %27, %cst_23 {dimension_numbers = #tpu.dot_dimension_numbers<[1], [0], [0], [1], [0, 0, 1, 1], [], []>} : vector<1x16xbf16>, vector<16x512xbf16>, vector<1x512xf32> -> vector<1x512xf32>
    %29 = arith.addf %2, %28 : vector<1x512xf32>
    %c0_24 = arith.constant 0 : index
    %c0_25 = arith.constant 0 : index
    %30 = vector.load %arg10[%c0_24, %c0_25] : memref<1x1xf32, #tpu.memory_space<vmem>>, vector<1x1xf32>
    %31 = vector.broadcast %30 : vector<1x1xf32> to vector<1x512xf32>
    %32 = arith.addf %29, %31 : vector<1x512xf32>
    %cst_26 = arith.constant 0.000000e+00 : f32
    %33 = vector.broadcast %cst_26 : f32 to vector<1x512xf32>
    %34 = arith.subf %33, %32 : vector<1x512xf32>
    %35 = math.exp %34 : vector<1x512xf32>
    %cst_27 = arith.constant 1.000000e+00 : f32
    %36 = vector.broadcast %cst_27 : f32 to vector<1x512xf32>
    %37 = arith.addf %36, %35 : vector<1x512xf32>
    %38 = tpu.reciprocal %37 : vector<1x512xf32> -> vector<1x512xf32>
    %c0_28 = arith.constant 0 : index
    %c0_29 = arith.constant 0 : index
    %39 = vector.load %arg11[%c0_28, %c0_29] : memref<1x512xf32, #tpu.memory_space<vmem>>, vector<1x512xf32>
    tpu.vector_store %arg11[%c0_28, %c0_29], %38 {strides = array<i32>} : memref<1x512xf32, #tpu.memory_space<vmem>>, vector<1x512xf32>,
    return
  }
  func.func @transform_0(%arg0: i32) -> (i32, i32) {
    %c0_i32 = arith.constant 0 : i32
    %c0_i32_0 = arith.constant 0 : i32
    return %c0_i32, %arg0 : i32, i32
  }
  func.func @transform_1(%arg0: i32) -> (i32, i32) {
    %c0_i32 = arith.constant 0 : i32
    %c0_i32_0 = arith.constant 0 : i32
    %c0_i32_1 = arith.constant 0 : i32
    return %c0_i32, %c0_i32_0 : i32, i32
  }
  func.func @transform_2(%arg0: i32) -> (i32, i32) {
    %c0_i32 = arith.constant 0 : i32
    %c0_i32_0 = arith.constant 0 : i32
    %c0_i32_1 = arith.constant 0 : i32
    return %c0_i32, %c0_i32_0 : i32, i32
  }
  func.func @transform_3(%arg0: i32) -> (i32, i32) {
    %c0_i32 = arith.constant 0 : i32
    %c0_i32_0 = arith.constant 0 : i32
    %c0_i32_1 = arith.constant 0 : i32
    return %c0_i32, %c0_i32_0 : i32, i32
  }
  func.func @transform_4(%arg0: i32) -> (i32, i32) {
    %c0_i32 = arith.constant 0 : i32
    %c0_i32_0 = arith.constant 0 : i32
    %c0_i32_1 = arith.constant 0 : i32
    return %c0_i32, %c0_i32_0 : i32, i32
  }
  func.func @transform_5(%arg0: i32) -> (i32, i32) {
    %c0_i32 = arith.constant 0 : i32
    %c0_i32_0 = arith.constant 0 : i32
    %c0_i32_1 = arith.constant 0 : i32
    return %c0_i32, %c0_i32_0 : i32, i32
  }
  func.func @transform_6(%arg0: i32) -> (i32, i32) {
    %c0_i32 = arith.constant 0 : i32
    %c0_i32_0 = arith.constant 0 : i32
    %c0_i32_1 = arith.constant 0 : i32
    return %c0_i32, %c0_i32_0 : i32, i32
  }
  func.func @transform_7(%arg0: i32) -> (i32, i32) {
    %c0_i32 = arith.constant 0 : i32
    %c0_i32_0 = arith.constant 0 : i32
    %c0_i32_1 = arith.constant 0 : i32
    return %c0_i32, %c0_i32_0 : i32, i32
  }
  func.func @transform_8(%arg0: i32) -> (i32, i32) {
    %c0_i32 = arith.constant 0 : i32
    %c0_i32_0 = arith.constant 0 : i32
    %c0_i32_1 = arith.constant 0 : i32
    return %c0_i32, %c0_i32_0 : i32, i32
  }
  func.func @transform_9(%arg0: i32) -> (i32, i32) {
    %c0_i32 = arith.constant 0 : i32
    %c0_i32_0 = arith.constant 0 : i32
    %c0_i32_1 = arith.constant 0 : i32
    return %c0_i32, %c0_i32_0 : i32, i32
  }
  func.func @transform_10(%arg0: i32) -> (i32, i32) {
    %c0_i32 = arith.constant 0 : i32
    %c0_i32_0 = arith.constant 0 : i32
    return %c0_i32, %arg0 : i32, i32
  }
}

</mosaic_0001>

<bundles_post_ra>
// kernel: tpu_custom_call.1
= control target key start
LH: loop header
LB: loop body
LE: loop exit
PB: predicated region body
PF: predicated region fallthrough
CT: control target
= control target key end

     0   :  { %s1538_s0 = inlined_call_operand.hbm [shape: bf16[86,512], index: 0, kind: input, shape index: {}]   ;;  %s1539_s1 = inlined_call_operand.vmem [shape: bf16[64,86], index: 1, kind: input, shape index: {}]   ;;  %s1540_s2 = inlined_call_operand.vmem [shape: f32[64,1], index: 2, kind: input, shape index: {}]   ;;  %s1541_s3 = inlined_call_operand.vmem [shape: bf16[32,64], index: 3, kind: input, shape index: {}]   ;;  %s1542_s4 = inlined_call_operand.vmem [shape: f32[32,1], index: 4, kind: input, shape index: {}]   ;;  %s1543_s5 = inlined_call_operand.vmem [shape: bf16[16,32], index: 5, kind: input, shape index: {}]   ;;  %s1544_s6 = inlined_call_operand.vmem [shape: f32[16,1], index: 6, kind: input, shape index: {}]   ;;  %s1545_s7 = inlined_call_operand.vmem [shape: bf16[1,16], index: 7, kind: input, shape index: {}]   ;;  %s1546_s8 = inlined_call_operand.vmem [shape: bf16[1,86], index: 8, kind: input, shape index: {}]   ;;  %s1547_s9 = inlined_call_operand.<no memory space> [shape: f32[1,1], index: 9, kind: input, shape index: {}]   ;;  %s1548_s10 = inlined_call_operand.hbm [shape: f32[1,512], index: 10, kind: output, shape index: {}]  }
   0x1   :  { %v15_v0 = vstv %s1547_s9 }
   0x2   :  { %16 = vst [vmem:[#allocation2] sm:$0x1] %v15_v0 }
   0x3   :  { %17 = vsyncpa [#allocation4], 0 }
   0x4   :  { %18 = vsyncpa [#allocation5], 0  ;;  %s1195_s15 = smov [#allocation3]  }
   0x5   :  { %s24_s16 = sshll.u32 %s1195_s15, 4  ;;  %s25_s16 = int_to_ptr.vmem [resolvable:$true] %s24_s16 }
   0x6   :  { %s1159_s17 = scalar_lea.vmem %s25_s16, 2816  ;;  %p1164_p1 = scmp.lt.s32.totalorder %s25_s16, %s25_s16 }
   0x7   :  { %p1160_p0 = scmp.ne.s32.totalorder %s25_s16, %s1159_s17  ;;  %p1165_p2 = scmp.lt.s32.totalorder %s1159_s17, %s1159_s17 }
   0x9   :  { %p1166_p3 = por %p1165_p2, %p1164_p1 }
   0xb   :  { %p1167_p4 = pnand %p1166_p3, %p1160_p0 }
   0xd   :  { %1170 = shalt.err (!%p1167_p4)
}
   0xe   :  { %s1196_s18 = smov 256   ;;  %s1197_s19 = smov 16  }
   0xf   :  { %30 = dma.hbm_to_vmem [thread:$0]  %s1538_s0, 2816, %s25_s16, [#allocation4], %s1196_s18, %s1196_s18, %s1197_s19  }
  0x10   :  { %1191 = dma.done.wait [#allocation4], 2816  }
  0x11   :  { %1192 = vsyncadd [#allocation4], 4294964480  ;;  %v1549_v1 = vmov 0   ;;  %v73_v2 = vld [vmem:[#allocation3 + $0xa0] sm:$0x77]  ;;  %vm275_vm0 = vcmask 1042432  }
  0x12   :  { %320 = vmatprep.mubr.bf16.mxu0 %v1549_v1  ;;  %393 = vmatprep.mubr.bf16.mxu1 %v1549_v1  ;;  %v74_v3 = vld [vmem:[#allocation3 + $0xa8] sm:$0x77]  ;;  %v1266_v4 = vcombine.high %v73_v2, %v73_v2  ;;  %v1057_v6 = vcombine.low %v73_v2, %v73_v2  ;;  %v1270_v8 = vld [vmem:[#allocation3 + $0x84] ss:$16 sps:$4 sm:$0xff]   ;;  %v1284_v12 = vld [vmem:[#allocation3 + $0x80] ss:$16 sps:$4 sm:$0xff]  }
  0x13   :  { %1092 = vset.pattern.permute.xlu0 %v1549_v1  ;;  %1093 = vset.pattern.permute.xlu1 %v1549_v1  ;;  %v1268_v5 = vcombine.high %v74_v3, %v74_v3  ;;  %v1059_v7 = vcombine.low %v74_v3, %v74_v3  ;;  %v1272_v9 = vld [vmem:[#allocation3 + $0x8c] ss:$16 sps:$4 sm:$0xff]   ;;  %v1288_v13 = vld [vmem:[#allocation3 + $0x88] ss:$16 sps:$4 sm:$0xff]   ;;  %v1292_v14 = vld [vmem:[#allocation3 + $0x64] ss:$16 sps:$4 sm:$0xff]  }
  0x14   :  { %1061 = vmatprep.subr.msk.bf16.mxu0 %vm275_vm0, %v1266_v4  ;;  %v1279_v10 = vsel %vm275_vm0, %v1057_v6, 0  ;;  %1567 = vst [vmem:[#allocation9_spill] sm:$0xff] %v1292_v14  ;;  %v1294_v15 = vld [vmem:[#allocation3 + $0x6c] ss:$16 sps:$4 sm:$0xff]   ;;  %v1296_v16 = vld [vmem:[#allocation3 + $0x60] ss:$16 sps:$4 sm:$0xff]  }
  0x15   :  { %1066 = vmatprep.subr.msk.bf16.mxu1 %vm275_vm0, %v1268_v5  ;;  %v1282_v11 = vsel %vm275_vm0, %v1059_v7, 0  ;;  %293 = vmatpush1.bf16.msra.mxu0 %v1279_v10  ;;  %1568 = vst [vmem:[#allocation10_spill] sm:$0xff] %v1294_v15  ;;  %1569 = vst [vmem:[#allocation11_spill] sm:$0xff] %v1296_v16  ;;  %v1300_v17 = vld [vmem:[#allocation3 + $0x68] ss:$16 sps:$4 sm:$0xff]   ;;  %v90_v28 = vld [vmem:[%s1540_s2 + $0x30] sm:$0xff] }
  0x16   :  { %366 = vmatpush1.bf16.msra.mxu1 %v1282_v11  ;;  %294 = vmatprep.subr.bf16.mxu0 %v1270_v8  ;;  %1570 = vst [vmem:[#allocation12_spill] sm:$0xff] %v1300_v17  ;;  %v1302_v18 = vld [vmem:[#allocation3 + $0x44] ss:$16 sps:$4 sm:$0xff]   ;;  %v1306_v19 = vld [vmem:[#allocation3 + $0x4c] ss:$16 sps:$4 sm:$0xff]   ;;  %vm262_vm1 = vcmask 703488  }
  0x17   :  { %367 = vmatprep.subr.bf16.mxu1 %v1272_v9  ;;  %1571 = vst [vmem:[#allocation13_spill] sm:$0xff] %v1302_v18  ;;  %1572 = vst [vmem:[#allocation14_spill] sm:$0xff] %v1306_v19  ;;  %v1308_v20 = vld [vmem:[#allocation3 + $0x40] ss:$16 sps:$4 sm:$0xff]   ;;  %v1312_v21 = vld [vmem:[#allocation3 + $0x48] ss:$16 sps:$4 sm:$0xff]   ;;  %124 = vperm.xlu0 %1092, %v90_v28  }
  0x18   :  { %1573 = vst [vmem:[#allocation15_spill] sm:$0xff] %v1308_v20  ;;  %1574 = vst [vmem:[#allocation16_spill] sm:$0xff] %v1312_v21  ;;  %v1316_v22 = vld [vmem:[#allocation3 + $0x24] ss:$16 sps:$4 sm:$0xff]   ;;  %v1318_v23 = vld [vmem:[#allocation3 + $0x2c] ss:$16 sps:$4 sm:$0xff]  }
  0x19   :  { %295 = vmatpush1.bf16.msra.mxu0 %v1284_v12  ;;  %1575 = vst [vmem:[#allocation17_spill] sm:$0xff] %v1316_v22  ;;  %1576 = vst [vmem:[#allocation18_spill] sm:$0xff] %v1318_v23  ;;  %v1320_v24 = vld [vmem:[#allocation3 + $0x20] ss:$16 sps:$4 sm:$0xff]   ;;  %v1322_v25 = vld [vmem:[#allocation3 + $0x28] ss:$16 sps:$4 sm:$0xff]  }
  0x1a   :  { %368 = vmatpush1.bf16.msra.mxu1 %v1288_v13  ;;  %296 = vmatprep.subr.bf16.mxu0 %v1292_v14  ;;  %1577 = vst [vmem:[#allocation19_spill] sm:$0xff] %v1320_v24  ;;  %1578 = vst [vmem:[#allocation20_spill] sm:$0xff] %v1322_v25  ;;  %v1326_v26 = vld [vmem:[#allocation3 + $0x4] ss:$16 sps:$4 sm:$0xff]   ;;  %v1330_v27 = vld [vmem:[#allocation3 + $0xc] ss:$16 sps:$4 sm:$0xff]  }
  0x1b   :  { %369 = vmatprep.subr.bf16.mxu1 %v1294_v15  ;;  %1579 = vst [vmem:[#allocation21_spill] sm:$0xff] %v1326_v26  ;;  %1580 = vst [vmem:[#allocation22_spill] sm:$0xff] %v1330_v27  ;;  %v88_v29 = vld [vmem:[%s1540_s2 + $0x20] sm:$0xff]  ;;  %v1342_v31 = vld [vmem:[#allocation3 + $0x8] ss:$16 sps:$4 sm:$0xff]   ;;  %vm520_vm2 = vcmask 523264  }
  0x1c   :  { %v1338_v30 = vld [vmem:[#allocation3] ss:$16 sps:$4 sm:$0xff]   ;;  %114 = vperm.xlu1 %1093, %v88_v29   ;;  %1582 = vst [vmem:[#allocation24_spill] sm:$0xff] %v1342_v31  ;;  %v91_v32 = vld [vmem:[%s1540_s2 + $0x38] sm:$0xff]  ;;  %v89_v33 = vld [vmem:[%s1540_s2 + $0x28] sm:$0xff]  ;;  %vm676_vm3 = vcmask 261120  }
  0x1d   :  { %297 = vmatpush1.bf16.msra.mxu0 %v1296_v16  ;;  %1581 = vst [vmem:[#allocation23_spill] sm:$0xff] %v1338_v30  ;;  %v1128_v34 = vld [vmem:[%s1539_s1] sm:$0xff]   ;;  %129 = vperm.xlu0 %1092, %v91_v32   ;;  %v86_v35 = vld [vmem:[%s1540_s2 + $0x10] sm:$0xff]  ;;  %v87_v36 = vld [vmem:[%s1540_s2 + $0x18] sm:$0xff]  ;;  %vm779_vm4 = vcmask 130048  }
  0x1e   :  { %370 = vmatpush1.bf16.msra.mxu1 %v1300_v17  ;;  %298 = vmatprep.subr.bf16.mxu0 %v1302_v18  ;;  %v84_v37 = vld [vmem:[%s1540_s2] sm:$0xff]  ;;  %v85_v38 = vld [vmem:[%s1540_s2 + $0x8] sm:$0xff]  ;;  %v488_v40 = vld [vmem:[%s1542_s4 + $0x10] sm:$0xff] }
  0x1f   :  { %371 = vmatprep.subr.bf16.mxu1 %v1306_v19  ;;  %v1129_v39 = vld [vmem:[%s1539_s1 + $0x8] sm:$0xff]   ;;  %v489_v41 = vld [vmem:[%s1542_s4 + $0x18] sm:$0xff]  ;;  %v486_v42 = vld [vmem:[%s1542_s4] sm:$0xff] }
  0x20   :  { %119 = vperm.xlu1 %1093, %v89_v33   ;;  %v487_v43 = vld [vmem:[%s1542_s4 + $0x8] sm:$0xff]  ;;  %v1130_v44 = vld [vmem:[%s1539_s1 + $0x10] sm:$0xff]   ;;  %v659_v45 = vld [vmem:[%s1544_s6] sm:$0xff] }
  0x21   :  { %299 = vmatpush1.bf16.msra.mxu0 %v1308_v20  ;;  %104 = vperm.xlu0 %1092, %v86_v35   ;;  %v660_v46 = vld [vmem:[%s1544_s6 + $0x8] sm:$0xff]  ;;  %v950_v47 = vld [vmem:[#allocation2] sm:$0x1]  ;;  %v1131_v48 = vld [vmem:[%s1539_s1 + $0x18] sm:$0xff]  }
  0x22   :  { %372 = vmatpush1.bf16.msra.mxu1 %v1312_v21  ;;  %300 = vmatprep.subr.bf16.mxu0 %v1316_v22 }
  0x23   :  { %373 = vmatprep.subr.bf16.mxu1 %v1318_v23 }
  0x24   :  { %109 = vperm.xlu1 %1093, %v87_v36  }
  0x25   :  { %301 = vmatpush1.bf16.msra.mxu0 %v1320_v24  ;;  %94 = vperm.xlu0 %1092, %v84_v37  }
  0x26   :  { %374 = vmatpush1.bf16.msra.mxu1 %v1322_v25  ;;  %302 = vmatprep.subr.bf16.mxu0 %v1326_v26 }
  0x27   :  { %375 = vmatprep.subr.bf16.mxu1 %v1330_v27 }
  0x28   :  { %99 = vperm.xlu1 %1093, %v85_v38  }
  0x29   :  { %303 = vmatpush1.bf16.msra.mxu0 %v1338_v30  ;;  %502 = vperm.xlu0 %1092, %v488_v40  }
  0x2a   :  { %376 = vmatpush1.bf16.msra.mxu1 %v1342_v31 }
  0x2c   :  { %1062 = vmatmul.mubr.msk.bf16.vlgmr.msra.gmra.mxu0 %vm262_vm1, %v1128_v34  ;;  %507 = vperm.xlu1 %1093, %v489_v41  }
  0x2d   :  { %1067 = vmatmul.mubr.msk.bf16.vlgmr.msra.gmra.mxu1 %vm262_vm1, %v1128_v34  ;;  %330 = vmatprep.mubr.bf16.mxu0 %v1549_v1 }
  0x2e   :  { %403 = vmatprep.mubr.bf16.mxu1 %v1549_v1  ;;  %492 = vperm.xlu0 %1092, %v486_v42  }
  0x30   :  { %497 = vperm.xlu1 %1093, %v487_v43  }
  0x32   :  { %663 = vperm.xlu0 %1092, %v659_v45  }
  0x34   :  { %1063 = vmatmul.mubr.msk.bf16.gmra.mxu0 %vm262_vm1, %v1129_v39  ;;  %668 = vperm.xlu1 %1093, %v660_v46  }
  0x35   :  { %1068 = vmatmul.mubr.msk.bf16.gmra.mxu1 %vm262_vm1, %v1129_v39  ;;  %340 = vmatprep.mubr.bf16.mxu0 %v1549_v1 }
  0x36   :  { %413 = vmatprep.mubr.bf16.mxu1 %v1549_v1  ;;  %953 = vperm.xlu0 %1092, %v950_v47  }
  0x3c   :  { %1064 = vmatmul.mubr.msk.bf16.gmra.mxu0 %vm262_vm1, %v1130_v44 }
  0x3d   :  { %1069 = vmatmul.mubr.msk.bf16.gmra.mxu1 %vm262_vm1, %v1130_v44  ;;  %350 = vmatprep.mubr.bf16.mxu0 %v1549_v1 }
  0x3e   :  { %423 = vmatprep.mubr.bf16.mxu1 %v1549_v1 }
  0x44   :  { %1065 = vmatmul.mubr.msk.bf16.gmra.mxu0 %vm262_vm1, %v1131_v48 }
  0x45   :  { %1070 = vmatmul.mubr.msk.bf16.gmra.mxu1 %vm262_vm1, %v1131_v48  ;;  %559 = vmatprep.mubr.bf16.mxu0 %v1549_v1 }
  0x46   :  { %612 = vmatprep.mubr.bf16.mxu1 %v1549_v1 }
  0x92   :  { %v125_v57 = vpop.permute.xlu0 %124 }
  0x97   :  { %v1420_v58 = vpop.permute.xlu1 %114 }
  0x98   :  { %v130_v2 = vpop.permute.xlu0 %129 }
  0x9b   :  { %v120_v3 = vpop.permute.xlu1 %119 }
  0x9c   :  { %v1426_v34 = vpop.permute.xlu0 %104 }
  0x9f   :  { %v110_v35 = vpop.permute.xlu1 %109 }
  0xa0   :  { %v1428_v42 = vpop.permute.xlu0 %94 }
  0xa3   :  { %v1430_v43 = vpop.permute.xlu1 %99 }
  0xec   :  { %v1412_v49 = vpop.f32.mrf.mxu0 }
  0xed   :  { %v1414_v50 = vpop.f32.mrf.mxu1 }
  0xee   :  { %v324_v51 = vpop.f32.mrf.mxu0 }
  0xef   :  { %v397_v52 = vpop.f32.mrf.mxu1  ;;  %v1433_v44 = vadd.f32 %v324_v51, %v1428_v42 }
  0xf0   :  { %v1416_v53 = vpop.f32.mrf.mxu0  ;;  %v1436_v45 = vadd.f32 %v397_v52, %v1428_v42 }
  0xf1   :  { %v1418_v54 = vpop.f32.mrf.mxu1 }
  0xf2   :  { %v328_v55 = vpop.f32.mrf.mxu0 }
  0xf3   :  { %v401_v56 = vpop.f32.mrf.mxu1  ;;  %v1439_v46 = vadd.f32 %v328_v55, %v1430_v43 }
  0xf4   :  { %v1422_v59 = vpop.f32.mrf.mxu0  ;;  %v1442_v47 = vadd.f32 %v401_v56, %v1430_v43 }
  0xf5   :  { %v1424_v60 = vpop.f32.mrf.mxu1 }
  0xf6   :  { %v334_v61 = vpop.f32.mrf.mxu0 }
  0xf7   :  { %v407_v62 = vpop.f32.mrf.mxu1  ;;  %v1445_v31 = vadd.f32 %v334_v61, %v1426_v34 }
  0xf8   :  { %v336_v63 = vpop.f32.mrf.mxu0  ;;  %v1448_v30 = vadd.f32 %v407_v62, %v1426_v34 }
  0xf9   :  { %v409_v0 = vpop.f32.mrf.mxu1  ;;  %v1450_v27 = vadd.f32 %v336_v63, %v110_v35 }
  0xfa   :  { %v338_v6 = vpop.f32.mrf.mxu0  ;;  %v1452_v51 = vadd.f32 %v409_v0, %v110_v35 }
  0xfb   :  { %v411_v7 = vpop.f32.mrf.mxu1  ;;  %v1454_v52 = vadd.f32 %v338_v6, %v110_v35 }
  0xfc   :  { %v342_v28 = vpop.f32.mrf.mxu0  ;;  %v1456_v26 = vadd.f32 %v411_v7, %v110_v35 }
  0xfd   :  { %v415_v29 = vpop.f32.mrf.mxu1 }
  0xfe   :  { %v344_v32 = vpop.f32.mrf.mxu0 }
  0xff   :  { %v417_v33 = vpop.f32.mrf.mxu1  ;;  %v345_v20 = vadd.f32 %v344_v32, %v1420_v58  ;;  %v343_v32 = vadd.f32 %v342_v28, %v1420_v58 }
 0x100   :  { %v346_v36 = vpop.f32.mrf.mxu0  ;;  %v418_v62 = vadd.f32 %v417_v33, %v1420_v58  ;;  %v416_v33 = vadd.f32 %v415_v29, %v1420_v58  ;;  %v333_v58 = vadd.f32 %v1422_v59, %v1426_v34  ;;  %v448_v59 = vmax.f32 %v1452_v51, 0.0 }
 0x101   :  { %v419_v37 = vpop.f32.mrf.mxu1  ;;  %v347_v6 = vadd.f32 %v346_v36, %v120_v3  ;;  %v437_v51 = vmax.f32 %v1436_v45, 0.0  ;;  %v1583_v45 = vmov 0  }
 0x102   :  { %v348_v38 = vpop.f32.mrf.mxu0  ;;  %v420_v17 = vadd.f32 %v419_v37, %v120_v3  ;;  %v453_v14 = vmax.f32 %v418_v62, 0.0  ;;  %v452_v28 = vmax.f32 %v416_v33, 0.0 }
 0x103   :  { %v421_v39 = vpop.f32.mrf.mxu1  ;;  %v349_v55 = vadd.f32 %v348_v38, %v120_v3  ;;  %v454_v37 = vmax.f32 %v347_v6, 0.0 }
 0x104   :  { %v352_v40 = vpop.f32.mrf.mxu0  ;;  %v422_v25 = vadd.f32 %v421_v39, %v120_v3 }
 0x105   :  { %v425_v41 = vpop.f32.mrf.mxu1  ;;  %v353_v63 = vadd.f32 %v352_v40, %v125_v57  ;;  %v455_v38 = vmax.f32 %v349_v55, 0.0 }
 0x106   :  { %v354_v48 = vpop.f32.mrf.mxu0  ;;  %v426_v19 = vadd.f32 %v425_v41, %v125_v57  ;;  %v457_v39 = vmax.f32 %v422_v25, 0.0  ;;  %v451_v41 = vmax.f32 %v345_v20, 0.0  ;;  %v450_v20 = vmax.f32 %v343_v32, 0.0  ;;  %v508_v32 = vpop.permute.xlu1 %507 }
 0x107   :  { %v427_v1 = vpop.f32.mrf.mxu1  ;;  %v355_v23 = vadd.f32 %v354_v48, %v125_v57  ;;  %v458_v40 = vmax.f32 %v353_v63, 0.0 }
 0x108   :  { %v356_v56 = vpop.f32.mrf.mxu0  ;;  %v428_v22 = vadd.f32 %v427_v1, %v125_v57  ;;  %v460_v57 = vmax.f32 %v426_v19, 0.0  ;;  %v481_v55 = vpack.c.bf16 %v457_v39, %v453_v14  ;;  %v406_v19 = vadd.f32 %v1424_v60, %v1426_v34 }
 0x109   :  { %v429_v24 = vpop.f32.mrf.mxu1  ;;  %v357_v21 = vadd.f32 %v356_v56, %v130_v2  ;;  %v459_v48 = vmax.f32 %v355_v23, 0.0  ;;  %v479_v23 = vpack.c.bf16 %v455_v38, %v451_v41  ;;  %v443_v14 = vmax.f32 %v1445_v31, 0.0 }
 0x10a   :  { %v430_v61 = vadd.f32 %v429_v24, %v130_v2  ;;  %v358_v0 = vpop.f32.mrf.mxu0  ;;  %v461_v1 = vmax.f32 %v428_v22, 0.0  ;;  %v449_v22 = vmax.f32 %v1456_v26, 0.0  ;;  %v446_v26 = vmax.f32 %v1450_v27, 0.0 }
 0x10b   :  { %v431_v18 = vpop.f32.mrf.mxu1  ;;  %v359_v7 = vadd.f32 %v358_v0, %v130_v2  ;;  %v462_v16 = vmax.f32 %v357_v21, 0.0  ;;  %v447_v21 = vmax.f32 %v1454_v52, 0.0  ;;  %v478_v60 = vpack.c.bf16 %v454_v37, %v450_v20 }
 0x10c   :  { %v432_v35 = vadd.f32 %v431_v18, %v130_v2  ;;  %v464_v15 = vmax.f32 %v430_v61, 0.0  ;;  %v456_v18 = vmax.f32 %v420_v17, 0.0  ;;  %v445_v17 = vmax.f32 %v1448_v30, 0.0 }
 0x10d   :  { %v463_v56 = vmax.f32 %v359_v7, 0.0  ;;  %v482_v2 = vpack.c.bf16 %v462_v16, %v458_v40  ;;  %v400_v16 = vadd.f32 %v1418_v54, %v1430_v43  ;;  %v439_v34 = vmax.f32 %v1439_v46, 0.0 }
 0x10e   :  { %v465_v24 = vmax.f32 %v432_v35, 0.0  ;;  %v484_v25 = vpack.c.bf16 %v464_v15, %v460_v57  ;;  %v327_v15 = vadd.f32 %v1416_v53, %v1430_v43  ;;  %v480_v29 = vpack.c.bf16 %v456_v18, %v452_v28  ;;  %v1133_v35 = vld [vmem:[%s1541_s3 + $0x8] sm:$0xff]   ;;  %v503_v57 = vpop.permute.xlu0 %502  ;;  %v498_v18 = vpop.permute.xlu1 %497 }
 0x10f   :  { %v483_v36 = vpack.c.bf16 %v463_v56, %v459_v48  ;;  %v441_v52 = vmax.f32 %v1442_v47, 0.0  ;;  %v475_v53 = vpack.c.bf16 %v447_v21, %v443_v14  ;;  %v477_v61 = vpack.c.bf16 %v449_v22, %v445_v17 }
 0x110   :  { %v485_v3 = vpack.c.bf16 %v465_v24, %v461_v1  ;;  %v323_v54 = vadd.f32 %v1412_v49, %v1428_v42  ;;  %v396_v30 = vadd.f32 %v1414_v50, %v1428_v42  ;;  %v442_v31 = vmax.f32 %v333_v58, 0.0 }
 0x111   :  { %535 = vmatprep.subr.bf16.mxu0 %v483_v36  ;;  %v444_v43 = vmax.f32 %v406_v19, 0.0  ;;  %v435_v27 = vmax.f32 %v1433_v44, 0.0  ;;  %v438_v46 = vmax.f32 %v327_v15, 0.0  ;;  %v440_v47 = vmax.f32 %v400_v16, 0.0  ;;  %v1132_v44 = vld [vmem:[%s1541_s3] sm:$0xff]  }
 0x112   :  { %588 = vmatprep.subr.bf16.mxu1 %v485_v3  ;;  %536 = vmatpush1.bf16.msra.mxu0 %v482_v2  ;;  %v474_v62 = vpack.c.bf16 %v446_v26, %v442_v31  ;;  %v473_v6 = vpack.c.bf16 %v441_v52, %v437_v51  ;;  %v434_v49 = vmax.f32 %v323_v54, 0.0  ;;  %v436_v7 = vmax.f32 %v396_v30, 0.0 }
 0x113   :  { %589 = vmatpush1.bf16.msra.mxu1 %v484_v25  ;;  %537 = vmatprep.subr.bf16.mxu0 %v479_v23  ;;  %v476_v63 = vpack.c.bf16 %v448_v59, %v444_v43  ;;  %v471_v0 = vpack.c.bf16 %v439_v34, %v435_v27  ;;  %v493_v23 = vpop.permute.xlu0 %492 }
 0x114   :  { %590 = vmatprep.subr.bf16.mxu1 %v481_v55  ;;  %v470_v50 = vpack.c.bf16 %v438_v46, %v434_v49  ;;  %v472_v42 = vpack.c.bf16 %v440_v47, %v436_v7 }
 0x116   :  { %538 = vmatpush1.bf16.msra.mxu0 %v478_v60 }
 0x117   :  { %591 = vmatpush1.bf16.msra.mxu1 %v480_v29  ;;  %539 = vmatprep.subr.bf16.mxu0 %v475_v53 }
 0x118   :  { %592 = vmatprep.subr.bf16.mxu1 %v477_v61 }
 0x11a   :  { %540 = vmatpush1.bf16.msra.mxu0 %v474_v62 }
 0x11b   :  { %593 = vmatpush1.bf16.msra.mxu1 %v476_v63  ;;  %541 = vmatprep.subr.bf16.mxu0 %v471_v0 }
 0x11c   :  { %594 = vmatprep.subr.bf16.mxu1 %v473_v6 }
 0x11e   :  { %542 = vmatpush1.bf16.msra.mxu0 %v470_v50 }
 0x11f   :  { %595 = vmatpush1.bf16.msra.mxu1 %v472_v42 }
 0x121   :  { %1073 = vmatmul.mubr.msk.bf16.vlgmr.msra.gmra.mxu0 %vm520_vm2, %v1132_v44 }
 0x122   :  { %1075 = vmatmul.mubr.msk.bf16.vlgmr.msra.gmra.mxu1 %vm520_vm2, %v1132_v44  ;;  %569 = vmatprep.mubr.bf16.mxu0 %v1583_v45 }
 0x123   :  { %622 = vmatprep.mubr.bf16.mxu1 %v1583_v45 }
 0x129   :  { %1074 = vmatmul.mubr.msk.bf16.gmra.mxu0 %vm520_vm2, %v1133_v35 }
 0x12a   :  { %1076 = vmatmul.mubr.msk.bf16.gmra.mxu1 %vm520_vm2, %v1133_v35  ;;  %712 = vmatprep.mubr.bf16.mxu0 %v1583_v45 }
 0x12b   :  { %755 = vmatprep.mubr.bf16.mxu1 %v1583_v45 }
 0x1e1   :  { %v561_v38 = vpop.f32.mrf.mxu0 }
 0x1e2   :  { %v614_v39 = vpop.f32.mrf.mxu1  ;;  %v562_v51 = vadd.f32 %v561_v38, %v493_v23 }
 0x1e3   :  { %v563_v48 = vpop.f32.mrf.mxu0  ;;  %v615_v46 = vadd.f32 %v614_v39, %v493_v23 }
 0x1e4   :  { %v616_v1 = vpop.f32.mrf.mxu1  ;;  %v564_v28 = vadd.f32 %v563_v48, %v493_v23 }
 0x1e5   :  { %v565_v56 = vpop.f32.mrf.mxu0  ;;  %v617_v15 = vadd.f32 %v616_v1, %v493_v23  ;;  %v633_v1 = vmax.f32 %v562_v51, 0.0  ;;  %v1598_v51 = vld [vmem:[#allocation23_spill] sm:$0xff] }
 0x1e6   :  { %v618_v24 = vpop.f32.mrf.mxu1  ;;  %v566_v59 = vadd.f32 %v565_v56, %v498_v18  ;;  %v634_v63 = vmax.f32 %v564_v28, 0.0  ;;  %v635_v56 = vmax.f32 %v615_v46, 0.0  ;;  %v1599_v46 = vld [vmem:[#allocation24_spill] sm:$0xff] }
 0x1e7   :  { %v567_v33 = vpop.f32.mrf.mxu0  ;;  %v619_v60 = vadd.f32 %v618_v24, %v498_v18  ;;  %v636_v0 = vmax.f32 %v617_v15, 0.0  ;;  %v1134_v24 = vld [vmem:[%s1543_s5] sm:$0xff]  }
 0x1e8   :  { %v620_v40 = vpop.f32.mrf.mxu1  ;;  %v568_v2 = vadd.f32 %v567_v33, %v498_v18  ;;  %v637_v7 = vmax.f32 %v566_v59, 0.0 }
 0x1e9   :  { %v571_v41 = vpop.f32.mrf.mxu0  ;;  %v621_v25 = vadd.f32 %v620_v40, %v498_v18  ;;  %v639_v50 = vmax.f32 %v619_v60, 0.0 }
 0x1ea   :  { %v624_v36 = vpop.f32.mrf.mxu1  ;;  %v572_v16 = vadd.f32 %v571_v41, %v503_v57  ;;  %v638_v52 = vmax.f32 %v568_v2, 0.0  ;;  %v651_v38 = vpack.c.bf16 %v637_v7, %v633_v1  ;;  %v664_v41 = vpop.permute.xlu0 %663 }
 0x1eb   :  { %v573_v3 = vpop.f32.mrf.mxu0  ;;  %v625_v14 = vadd.f32 %v624_v36, %v503_v57  ;;  %v640_v53 = vmax.f32 %v621_v25, 0.0  ;;  %v653_v39 = vpack.c.bf16 %v639_v50, %v635_v56  ;;  %v669_v36 = vpop.permute.xlu1 %668 }
 0x1ec   :  { %v626_v37 = vpop.f32.mrf.mxu1  ;;  %v574_v55 = vadd.f32 %v573_v3, %v503_v57  ;;  %v641_v47 = vmax.f32 %v572_v16, 0.0  ;;  %v652_v35 = vpack.c.bf16 %v638_v52, %v634_v63 }
 0x1ed   :  { %v575_v21 = vpop.f32.mrf.mxu0  ;;  %v627_v58 = vadd.f32 %v626_v37, %v503_v57  ;;  %v643_v62 = vmax.f32 %v625_v14, 0.0  ;;  %v654_v48 = vpack.c.bf16 %v640_v53, %v636_v0 }
 0x1ee   :  { %v628_v22 = vpop.f32.mrf.mxu1  ;;  %v576_v19 = vadd.f32 %v575_v21, %v508_v32  ;;  %v642_v30 = vmax.f32 %v574_v55, 0.0  ;;  %v954_v1 = vpop.permute.xlu0 %953 }
 0x1ef   :  { %v629_v20 = vadd.f32 %v628_v22, %v508_v32  ;;  %v577_v17 = vpop.f32.mrf.mxu0  ;;  %v644_v31 = vmax.f32 %v627_v58, 0.0 }
 0x1f0   :  { %v630_v26 = vpop.f32.mrf.mxu1  ;;  %v578_v29 = vadd.f32 %v577_v17, %v508_v32  ;;  %v645_v61 = vmax.f32 %v576_v19, 0.0 }
 0x1f1   :  { %v631_v34 = vadd.f32 %v630_v26, %v508_v32  ;;  %v647_v54 = vmax.f32 %v629_v20, 0.0 }
 0x1f2   :  { %v646_v43 = vmax.f32 %v578_v29, 0.0  ;;  %v655_v42 = vpack.c.bf16 %v645_v61, %v641_v47  ;;  %v774_v61 = vld [vmem:[%s1545_s7] sm:$0x1] }
 0x1f3   :  { %v648_v27 = vmax.f32 %v631_v34, 0.0  ;;  %v657_v44 = vpack.c.bf16 %v647_v54, %v643_v62  ;;  %v1586_v54 = vld [vmem:[#allocation11_spill] sm:$0xff]  ;;  %v75_v47 = vld [vmem:[%s1546_s8] sm:$0x1]  ;;  %s1200_s8 = smov [#allocation6]  }
 0x1f4   :  { %v656_v6 = vpack.c.bf16 %v646_v43, %v642_v30  ;;  %v1591_v30 = vld [vmem:[#allocation16_spill] sm:$0xff]  ;;  %v1596_v43 = vld [vmem:[#allocation21_spill] sm:$0xff]  ;;  %s1024_s17 = sshll.u32 %s1200_s8, 4  ;;  %s1025_s17 = int_to_ptr.vmem [resolvable:$true] %s1024_s17 }
 0x1f5   :  { %v658_v49 = vpack.c.bf16 %v648_v27, %v644_v31  ;;  %v1595_v31 = vld [vmem:[#allocation20_spill] sm:$0xff]  ;;  %v1597_v27 = vld [vmem:[#allocation22_spill] sm:$0xff]  ;;  %s1171_s18 = scalar_lea.vmem %s1025_s17, 64  ;;  %p1176_p6 = scmp.lt.s32.totalorder %s1025_s17, %s1025_s17 }
 0x1f6   :  { %692 = vmatprep.subr.bf16.mxu0 %v656_v6  ;;  %p1172_p5 = scmp.ne.s32.totalorder %s1025_s17, %s1171_s18  ;;  %p1177_p7 = scmp.lt.s32.totalorder %s1171_s18, %s1171_s18 }
 0x1f7   :  { %735 = vmatprep.subr.bf16.mxu1 %v658_v49  ;;  %693 = vmatpush1.bf16.msra.mxu0 %v655_v42 }
 0x1f8   :  { %736 = vmatpush1.bf16.msra.mxu1 %v657_v44  ;;  %694 = vmatprep.subr.bf16.mxu0 %v652_v35  ;;  %v956_v44 = vlaneseq  ;;  %p1178_p8 = por %p1177_p7, %p1176_p6 }
 0x1f9   :  { %737 = vmatprep.subr.bf16.mxu1 %v654_v48 }
 0x1fa   :  { %v957_v35 = vshrl.u32 %v956_v44, 7  ;;  %vm1015_vm5 = vcmp.lt.s32.totalorder %v956_v44, 512  ;;  %p1179_p9 = pnand %p1178_p8, %p1172_p5 }
 0x1fb   :  { %695 = vmatpush1.bf16.msra.mxu0 %v651_v38 }
 0x1fc   :  { %738 = vmatpush1.bf16.msra.mxu1 %v653_v39  ;;  %v958_v48 = vsub.s32 0, %v957_v35 }
 0x1fe   :  { %1078 = vmatmul.mubr.msk.bf16.vlgmr.msra.gmra.mxu0 %vm676_vm3, %v1134_v24  ;;  %v959_v39 = vrot.slane %v954_v1, %v958_v48 }
 0x1ff   :  { %1079 = vmatmul.mubr.msk.bf16.vlgmr.msra.gmra.mxu1 %vm676_vm3, %v1134_v24  ;;  %815 = vmatprep.mubr.bf16.mxu0 %v1583_v45 }
 0x200   :  { %856 = vmatprep.mubr.bf16.mxu1 %v1583_v45 }
 0x2be   :  { %v714_v32 = vpop.f32.mrf.mxu0 }
 0x2bf   :  { %v757_v33 = vpop.f32.mrf.mxu1  ;;  %v715_v22 = vadd.f32 %v714_v32, %v664_v41 }
 0x2c0   :  { %v716_v40 = vpop.f32.mrf.mxu0  ;;  %v758_v23 = vadd.f32 %v757_v33, %v664_v41 }
 0x2c1   :  { %v759_v57 = vpop.f32.mrf.mxu1  ;;  %v717_v18 = vadd.f32 %v716_v40, %v664_v41  ;;  %v766_v59 = vmax.f32 %v715_v22, 0.0 }
 0x2c2   :  { %v718_v3 = vpop.f32.mrf.mxu0  ;;  %v760_v2 = vadd.f32 %v759_v57, %v664_v41  ;;  %v768_v60 = vmax.f32 %v758_v23, 0.0 }
 0x2c3   :  { %v761_v37 = vpop.f32.mrf.mxu1  ;;  %v719_v25 = vadd.f32 %v718_v3, %v669_v36  ;;  %v767_v16 = vmax.f32 %v717_v18, 0.0 }
 0x2c4   :  { %v762_v21 = vadd.f32 %v761_v37, %v669_v36  ;;  %v720_v55 = vpop.f32.mrf.mxu0  ;;  %v769_v14 = vmax.f32 %v760_v2, 0.0 }
 0x2c5   :  { %v763_v58 = vpop.f32.mrf.mxu1  ;;  %v721_v19 = vadd.f32 %v720_v55, %v669_v36  ;;  %v770_v28 = vmax.f32 %v719_v25, 0.0 }
 0x2c6   :  { %v764_v20 = vadd.f32 %v763_v58, %v669_v36  ;;  %v772_v15 = vmax.f32 %v762_v21, 0.0 }
 0x2c7   :  { %v771_v17 = vmax.f32 %v721_v19, 0.0  ;;  %v775_v52 = vpack.c.bf16 %v770_v28, %v766_v59 }
 0x2c8   :  { %v773_v26 = vmax.f32 %v764_v20, 0.0  ;;  %v777_v53 = vpack.c.bf16 %v772_v15, %v768_v60 }
 0x2c9   :  { %v776_v29 = vpack.c.bf16 %v771_v17, %v767_v16 }
 0x2ca   :  { %v778_v34 = vpack.c.bf16 %v773_v26, %v769_v14 }
 0x2cb   :  { %797 = vmatprep.subr.bf16.mxu0 %v776_v29 }
 0x2cc   :  { %838 = vmatprep.subr.bf16.mxu1 %v778_v34  ;;  %798 = vmatpush1.bf16.msra.mxu0 %v775_v52 }
 0x2cd   :  { %839 = vmatpush1.bf16.msra.mxu1 %v777_v53  ;;  %1082 = vmatprep.subr.msk.bf16.mxu0 %vm275_vm0, %v1266_v4  ;;  %v1584_v4 = vld [vmem:[#allocation9_spill] sm:$0xff]  ;;  %v1199_v53 = vmov 1966171168  }
 0x2ce   :  { %1084 = vmatprep.subr.msk.bf16.mxu1 %vm275_vm0, %v1268_v5  ;;  %v1585_v5 = vld [vmem:[#allocation10_spill] sm:$0xff] }
 0x2cf   :  { %1080 = vmatmul.mubr.msk.bf16.vlgmr.msra.gmra.mxu0 %vm779_vm4, %v774_v61 }
 0x2d0   :  { %1081 = vmatmul.mubr.msk.bf16.vlgmr.msra.gmra.mxu1 %vm779_vm4, %v774_v61  ;;  %873 = vmatpush1.bf16.msra.mxu0 %v1279_v10  ;;  %v1587_v10 = vld [vmem:[#allocation12_spill] sm:$0xff]  ;;  %v991_v61 = vunpack.c.l.s4 %v1199_v53 }
 0x2d1   :  { %914 = vmatpush1.bf16.msra.mxu1 %v1282_v11  ;;  %874 = vmatprep.subr.bf16.mxu0 %v1270_v8  ;;  %v1588_v11 = vld [vmem:[#allocation13_spill] sm:$0xff]  ;;  %v1589_v8 = vld [vmem:[#allocation14_spill] sm:$0xff] }
 0x2d2   :  { %915 = vmatprep.subr.bf16.mxu1 %v1272_v9  ;;  %900 = vmatprep.mubr.bf16.mxu0 %v1583_v45  ;;  %v1590_v9 = vld [vmem:[#allocation15_spill] sm:$0xff] }
 0x2d3   :  { %941 = vmatprep.mubr.bf16.mxu1 %v1583_v45  ;;  %v1592_v45 = vld [vmem:[#allocation17_spill] sm:$0xff] }
 0x2d4   :  { %875 = vmatpush1.bf16.msra.mxu0 %v1284_v12  ;;  %v1593_v12 = vld [vmem:[#allocation18_spill] sm:$0xff] }
 0x2d5   :  { %916 = vmatpush1.bf16.msra.mxu1 %v1288_v13  ;;  %876 = vmatprep.subr.bf16.mxu0 %v1584_v4  ;;  %v1594_v13 = vld [vmem:[#allocation19_spill] sm:$0xff]  ;;  %v992_v4 = vunpack.c.0.s8 %v991_v61 }
 0x2d6   :  { %917 = vmatprep.subr.bf16.mxu1 %v1585_v5 }
 0x2d8   :  { %877 = vmatpush1.bf16.msra.mxu0 %v1586_v54 }
 0x2d9   :  { %918 = vmatpush1.bf16.msra.mxu1 %v1587_v10  ;;  %878 = vmatprep.subr.bf16.mxu0 %v1588_v11  ;;  %v995_v10 = vsub.s32 %v992_v4, %v957_v35 }
 0x2da   :  { %919 = vmatprep.subr.bf16.mxu1 %v1589_v8 }
 0x2dc   :  { %879 = vmatpush1.bf16.msra.mxu0 %v1590_v9 }
 0x2dd   :  { %920 = vmatpush1.bf16.msra.mxu1 %v1591_v30  ;;  %880 = vmatprep.subr.bf16.mxu0 %v1592_v45 }
 0x2de   :  { %921 = vmatprep.subr.bf16.mxu1 %v1593_v12 }
 0x2e0   :  { %881 = vmatpush1.bf16.msra.mxu0 %v1594_v13 }
 0x2e1   :  { %922 = vmatpush1.bf16.msra.mxu1 %v1595_v31  ;;  %882 = vmatprep.subr.bf16.mxu0 %v1596_v43 }
 0x2e2   :  { %923 = vmatprep.subr.bf16.mxu1 %v1597_v27 }
 0x2e4   :  { %883 = vmatpush1.bf16.msra.mxu0 %v1598_v51 }
 0x2e5   :  { %924 = vmatpush1.bf16.msra.mxu1 %v1599_v46 }
 0x2e7   :  { %1083 = vmatmul.mubr.msk.bf16.vlgmr.msra.gmra.mxu0 %vm262_vm1, %v75_v47 }
 0x2e8   :  { %1085 = vmatmul.mubr.msk.bf16.vlgmr.msra.gmra.mxu1 %vm262_vm1, %v75_v47 }
 0x38f   :  { %v817_v62 = vpop.f32.mrf.mxu0 }
 0x390   :  { %v858_v63 = vpop.f32.mrf.mxu1 }
 0x391   :  { %v819_v0 = vpop.f32.mrf.mxu0 }
 0x392   :  { %v860_v6 = vpop.f32.mrf.mxu1 }
 0x393   :  { %v821_v49 = vpop.f32.mrf.mxu0 }
 0x394   :  { %v862_v7 = vpop.f32.mrf.mxu1 }
 0x395   :  { %v822_v50 = vpop.f32.mrf.mxu0 }
 0x396   :  { %v863_v42 = vpop.f32.mrf.mxu1 }
 0x3a7   :  { %v902_v56 = vpop.f32.mrf.mxu0 }
 0x3a8   :  { %v943_v38 = vpop.f32.mrf.mxu1  ;;  %v903_v24 = vadd.f32 %v902_v56, %v817_v62 }
 0x3a9   :  { %v944_v32 = vadd.f32 %v943_v38, %v858_v63  ;;  %v904_v33 = vpop.f32.mrf.mxu0 }
 0x3aa   :  { %v945_v40 = vpop.f32.mrf.mxu1  ;;  %v960_v57 = vadd.f32 %v959_v39, %v903_v24  ;;  %v905_v36 = vadd.f32 %v904_v33, %v819_v0 }
 0x3ab   :  { %v962_v41 = vadd.f32 %v959_v39, %v944_v32  ;;  %v946_v3 = vadd.f32 %v945_v40, %v860_v6  ;;  %v906_v37 = vpop.f32.mrf.mxu0 }
 0x3ac   :  { %v947_v18 = vpop.f32.mrf.mxu1  ;;  %v964_v2 = vsub.f32 0.0, %v960_v57  ;;  %v961_v21 = vadd.f32 %v959_v39, %v905_v36 }
 0x3ad   :  { %v966_v25 = vsub.f32 0.0, %v962_v41  ;;  %v963_v22 = vadd.f32 %v959_v39, %v946_v3  ;;  %v907_v23 = vpop.f32.mrf.mxu0 }
 0x3ae   :  { %v948_v55 = vpop.f32.mrf.mxu1  ;;  %v968_v58 = vmul.f32 1.442695, %v964_v2  ;;  %v965_v20 = vsub.f32 0.0, %v961_v21 }
 0x3af   :  { %v972_v19 = vmul.f32 1.442695, %v966_v25  ;;  %v967_v28 = vsub.f32 0.0, %v963_v22 }
 0x3b0   :  { %1135 = vpow2.f32 %v968_v58  ;;  %v970_v15 = vmul.f32 1.442695, %v965_v20 }
 0x3b1   :  { %v974_v16 = vmul.f32 1.442695, %v967_v28  ;;  %1137 = vpow2.f32 %v972_v19 }
 0x3b2   :  { %1139 = vpow2.f32 %v970_v15 }
 0x3b3   :  { %1141 = vpow2.f32 %v974_v16 }
 0x3bd   :  { %v1136_v14 = vpop.eup %1135 }
 0x3be   :  { %v1138_v17 = vpop.eup %1137  ;;  %v976_v26 = vadd.f32 1.0, %v1136_v14 }
 0x3bf   :  { %v1140_v59 = vpop.eup %1139  ;;  %v978_v60 = vadd.f32 1.0, %v1138_v17 }
 0x3c0   :  { %v1142_v29 = vpop.eup %1141  ;;  %1143 = vrcp.f32 %v976_v26  ;;  %v977_v34 = vadd.f32 1.0, %v1140_v59 }
 0x3c1   :  { %1145 = vrcp.f32 %v978_v60  ;;  %v979_v52 = vadd.f32 1.0, %v1142_v29 }
 0x3c2   :  { %1147 = vrcp.f32 %v977_v34 }
 0x3c3   :  { %1149 = vrcp.f32 %v979_v52 }
 0x3cd   :  { %v1144_v5 = vpop.eup %1143 }
 0x3ce   :  { %v1146_v54 = vpop.eup %1145 }
 0x3cf   :  { %v1148_v11 = vpop.eup %1147 }
 0x3d0   :  { %v1150_v8 = vpop.eup %1149  ;;  %v988_v9 = vcombine.low %v1144_v5, %v1148_v11 }
 0x3d1   :  { %v989_v30 = vcombine.low %v1146_v54, %v1150_v8 }
 0x3d2   :  { %v996_v45 = vrot.slane %v988_v9, %v995_v10 }
 0x3d3   :  { %v1003_v12 = vrot.slane %v989_v30, %v995_v10 }
 0x3d5   :  { %v1004_v13 = vcombine.low %v996_v45, %v1003_v12 }
 0x3d7   :  { %v1011_v31 = vrot.slane %v1004_v13, %v995_v10 }
 0x3d9   :  { %1017 = vst.msk [vmem:[#allocation6] sm:$0xf] %vm1015_vm5, %v1011_v31 }
 0x3da   :  { %1182 = shalt.err (!%p1179_p9)
}
 0x3db   :  { %1027 = dma.vmem_to_hbm [thread:$0]  %s1025_s17, 64, %s1548_s10, [#allocation5]  }
 0x3dc   :  { %1193 = dma.done.wait [#allocation5], 64  }
 0x3dd   :  { %1194 = vsyncadd [#allocation5], 4294967232 }
 0x3de   :  { %1031 = vsyncpa [#allocation4], 1 }
 0x3df   :  { %1032 = vsyncpa [#allocation5], 1 }

</bundles_post_ra>
